<compile_context>
chip_gen: v5e
topology: v5e:2x2
jax: 0.10.0
libtpu: 0.0.40
codegen_flags: <defaults>
</compile_context>

<pallas_src>
import functools

import jax
import jax.numpy as jnp
from jax.experimental import pallas as pl
from jax.experimental.pallas import tpu as pltpu


# ---- reproduce the module-level globals from the original script ------------
ascii_art = [
    "  ##  ",
    " #..# ",
    " #### ",
    " #..# ",
]
max_width = max(len(row) for row in ascii_art)
ascii_art = [row.ljust(max_width) for row in ascii_art]
all_chars = sorted(set("".join(ascii_art)))
n_classes = len(all_chars)  # number of distinct ASCII characters


# ---- Pallas kernel -----------------------------------------------------------
def _mlp_kernel(input_dim, output_dim, x_ref, w1_ref, b1_ref, w2_ref, b2_ref,
                w3_ref, b3_ref, o_ref):
    x = x_ref[...]            # (tile_n, input_dim) f32
    w1 = w1_ref[...]          # (input_dim, H)      f32

    # Layer 1: contraction depth == input_dim (2).  A 2-deep MXU contraction
    # still pays a full MXU pass + K padding, so do it on the VPU instead:
    # h1 = sum_k x[:, k:k+1] * W1[k:k+1, :] + b1   (broadcast FMAs).
    h1 = x[:, 0:1] * w1[0:1, :]
    for k in range(1, input_dim):  # static unroll (input_dim is tiny)
        h1 = h1 + x[:, k : k + 1] * w1[k : k + 1, :]
    h1 = jnp.maximum(h1 + b1_ref[...], 0.0)

    # Layer 2: relu(h1 @ W2 + b2) -- MXU, bf16 operands, f32 accumulation.
    h2 = jnp.dot(h1.astype(jnp.bfloat16), w2_ref[...],
                 preferred_element_type=jnp.float32)
    h2 = jnp.maximum(h2 + b2_ref[...], 0.0)

    # Layer 3: h2 @ W3 + b3 (no activation).  W3/b3 are lane-padded to 128
    # only as MXU operands; slice to the real logits before the store so the
    # HBM writeback is the true (tile_n, output_dim) payload, not a padded
    # 128-lane slab.
    logits = jnp.dot(h2.astype(jnp.bfloat16), w3_ref[...],
                     preferred_element_type=jnp.float32) + b3_ref[...]
    o_ref[...] = logits[:, :output_dim]


def prepare_params(params):
    """One-time parameter prep: lane-pad W3/b3 to a multiple of 128 (zero
    columns, MXU operand only) and cast the MXU weights to bf16."""
    w1, b1, w2, b2, w3, b3 = params
    output_dim = w3.shape[1]
    out_pad = 128 * pl.cdiv(output_dim, 128)
    if out_pad != output_dim:
        w3 = jnp.pad(w3, ((0, 0), (0, out_pad - output_dim)))
        b3 = jnp.pad(b3, ((0, 0), (0, out_pad - output_dim)))
    w2 = w2.astype(jnp.bfloat16)
    w3 = w3.astype(jnp.bfloat16)
    return (w1, b1, w2, b2, w3, b3), output_dim


@functools.partial(jax.jit, static_argnames=("output_dim",))
def ascii_mlp_forward(x, prepared_params, *, output_dim):
    """x: [N, input_dim] f32.  Returns logits [N, output_dim] f32."""
    w1, b1, w2, b2, w3, b3 = prepared_params
    n, input_dim = x.shape
    hidden_dim = w1.shape[1]
    out_pad = w3.shape[1]     # lane-padded MXU operand width

    # Batch tiling (all shapes static under jit):
    #   * tiny N  -> single step (launch/DMA latency regime),
    #   * mid N   -> >=2 "parallel" tiles so both v7x TensorCores get work,
    #   * large N -> 1024-row tiles (few pipeline steps; VMEM trivial at H=128).
    if n < 256:
        n_pad = 8 * pl.cdiv(n, 8)
        tile_n = n_pad
    elif n <= 2048:
        n_pad = 16 * pl.cdiv(n, 16)
        tile_n = n_pad // 2
    else:
        tile_n = 1024
        n_pad = tile_n * pl.cdiv(n, tile_n)
    if n_pad != n:
        x = jnp.pad(x, ((0, n_pad - n), (0, 0)))

    grid = (n_pad // tile_n,)

    # Weights/biases use a constant (0, 0) block index: loaded once, resident
    # across the batch tiles.  (pipeline_mode=pl.Buffered(1) only matters if
    # hidden_dim grows enough to pressure VMEM -- not at H=128.)
    full = lambda shape: pl.BlockSpec(shape, lambda i: (0, 0))

    out = pl.pallas_call(
        functools.partial(_mlp_kernel, input_dim, output_dim),
        out_shape=jax.ShapeDtypeStruct((n_pad, output_dim), jnp.float32),
        grid_spec=pltpu.PrefetchScalarGridSpec(
            num_scalar_prefetch=0,
            grid=grid,
            in_specs=[
                pl.BlockSpec((tile_n, input_dim), lambda i: (i, 0)),  # x tile
                full((input_dim, hidden_dim)),                         # W1 f32
                full((1, hidden_dim)),                                 # b1 f32
                full((hidden_dim, hidden_dim)),                        # W2 bf16
                full((1, hidden_dim)),                                 # b2 f32
                full((hidden_dim, out_pad)),                           # W3 bf16 (padded)
                full((1, out_pad)),                                    # b3 f32  (padded)
            ],
            # Last dim == full array dim (output_dim), second-to-last a
            # multiple of 8 -> legal, narrow (unpadded) store.
            out_specs=pl.BlockSpec((tile_n, output_dim), lambda i: (i, 0)),
        ),
        compiler_params=pltpu.CompilerParams(
            dimension_semantics=("parallel",)
        ),
    )(x, w1, b1, w2, b2, w3, b3)

    # Drop batch padding only (no column padding in the output anymore).
    return out[:n] if n_pad != n else out


def init_params(key, input_dim=2, hidden_dim=128, output_dim=n_classes):
    """Deterministic synthetic init (shapes match the nn.Linear layers)."""
    k1, k2, k3 = jax.random.split(key, 3)
    # stored as [in, out] (i.e. PyTorch weight transposed)
    w1 = jax.random.normal(k1, (input_dim, hidden_dim), jnp.float32) * 0.5
    b1 = jnp.zeros((1, hidden_dim), jnp.float32)
    w2 = jax.random.normal(k2, (hidden_dim, hidden_dim), jnp.float32) * (1.0 / 16.0)
    b2 = jnp.zeros((1, hidden_dim), jnp.float32)
    w3 = jax.random.normal(k3, (hidden_dim, output_dim), jnp.float32) * (1.0 / 16.0)
    b3 = jnp.zeros((1, output_dim), jnp.float32)
    return (w1, b1, w2, b2, w3, b3)


def reference_forward(x, params):
    """Pure-JAX f32 reference (matches the PyTorch forward)."""
    w1, b1, w2, b2, w3, b3 = params
    h1 = jnp.maximum(x @ w1 + b1, 0.0)
    h2 = jnp.maximum(h1 @ w2 + b2, 0.0)
    return h2 @ w3 + b3


if __name__ == "__main__":
    key = jax.random.PRNGKey(0)
    kx, kp = jax.random.split(key)

    # batch of 16 (row, col)-style coordinate pairs, input_dim=2
    x = jax.random.normal(kx, (16, 2), jnp.float32)
    params = init_params(kp)
    prepared, out_dim = prepare_params(params)

    out = ascii_mlp_forward(x, prepared, output_dim=out_dim)
    out = jax.block_until_ready(out)

    ref = reference_forward(x, params)
    assert out.shape == (16, n_classes), out.shape
    # bf16 MXU operands with f32 accumulation: loosen tolerance vs f32 ref.
    assert jnp.allclose(out, ref, atol=2e-2, rtol=2e-2), float(
        jnp.max(jnp.abs(out - ref)))

    print("KERNEL_OK")
</pallas_src>

<mosaic_0001>
module attributes {stable_mosaic.version = 11 : i64} {
  func.func @_mlp_kernel(%arg0: i32, %arg1: memref<16x2xf32, #tpu.memory_space<vmem>>, %arg2: memref<2x128xf32, #tpu.memory_space<vmem>>, %arg3: memref<1x128xf32, #tpu.memory_space<vmem>>, %arg4: memref<128x128xbf16, #tpu.memory_space<vmem>>, %arg5: memref<1x128xf32, #tpu.memory_space<vmem>>, %arg6: memref<128x128xbf16, #tpu.memory_space<vmem>>, %arg7: memref<1x128xf32, #tpu.memory_space<vmem>>, %arg8: memref<16x3xf32, #tpu.memory_space<vmem>>) attributes {dimension_semantics = [#tpu.dimension_semantics<parallel>], iteration_bounds = array<i64: 1>, scalar_prefetch = 0 : i64, scratch_operands = 0 : i64, tpu.core_type = #tpu.core_type<tc>, window_params = [{transform_indices = @transform_0, window_bounds = array<i64: 16, 2>}, {pipeline_mode = #tpu.pipeline_mode<synchronous>, transform_indices = @transform_1, window_bounds = array<i64: 2, 128>}, {pipeline_mode = #tpu.pipeline_mode<synchronous>, transform_indices = @transform_2, window_bounds = array<i64: 1, 128>}, {pipeline_mode = #tpu.pipeline_mode<synchronous>, transform_indices = @transform_3, window_bounds = array<i64: 128, 128>}, {pipeline_mode = #tpu.pipeline_mode<synchronous>, transform_indices = @transform_4, window_bounds = array<i64: 1, 128>}, {pipeline_mode = #tpu.pipeline_mode<synchronous>, transform_indices = @transform_5, window_bounds = array<i64: 128, 128>}, {pipeline_mode = #tpu.pipeline_mode<synchronous>, transform_indices = @transform_6, window_bounds = array<i64: 1, 128>}, {transform_indices = @transform_7, window_bounds = array<i64: 16, 3>}]} {
    %c0 = arith.constant 0 : index
    %c0_0 = arith.constant 0 : index
    %0 = vector.load %arg1[%c0, %c0_0] : memref<16x2xf32, #tpu.memory_space<vmem>>, vector<16x2xf32>
    %c0_1 = arith.constant 0 : index
    %c0_2 = arith.constant 0 : index
    %1 = vector.load %arg2[%c0_1, %c0_2] : memref<2x128xf32, #tpu.memory_space<vmem>>, vector<2x128xf32>
    %2 = vector.extract_strided_slice %0 {offsets = [0, 0], sizes = [16, 1], strides = [1, 1]} : vector<16x2xf32> to vector<16x1xf32>
    %3 = vector.extract_strided_slice %1 {offsets = [0, 0], sizes = [1, 128], strides = [1, 1]} : vector<2x128xf32> to vector<1x128xf32>
    %4 = vector.broadcast %2 : vector<16x1xf32> to vector<16x128xf32>
    %5 = vector.broadcast %3 : vector<1x128xf32> to vector<16x128xf32>
    %6 = arith.mulf %4, %5 : vector<16x128xf32>
    %7 = vector.extract_strided_slice %0 {offsets = [0, 1], sizes = [16, 1], strides = [1, 1]} : vector<16x2xf32> to vector<16x1xf32>
    %8 = vector.extract_strided_slice %1 {offsets = [1, 0], sizes = [1, 128], strides = [1, 1]} : vector<2x128xf32> to vector<1x128xf32>
    %9 = vector.broadcast %7 : vector<16x1xf32> to vector<16x128xf32>
    %10 = vector.broadcast %8 : vector<1x128xf32> to vector<16x128xf32>
    %11 = arith.mulf %9, %10 : vector<16x128xf32>
    %12 = arith.addf %6, %11 : vector<16x128xf32>
    %c0_3 = arith.constant 0 : index
    %c0_4 = arith.constant 0 : index
    %13 = vector.load %arg3[%c0_3, %c0_4] : memref<1x128xf32, #tpu.memory_space<vmem>>, vector<1x128xf32>
    %14 = vector.broadcast %13 : vector<1x128xf32> to vector<16x128xf32>
    %15 = arith.addf %12, %14 : vector<16x128xf32>
    %cst = arith.constant 0.000000e+00 : f32
    %16 = vector.broadcast %cst : f32 to vector<16x128xf32>
    %17 = arith.maximumf %15, %16 : vector<16x128xf32>
    %18 = arith.truncf %17 : vector<16x128xf32> to vector<16x128xbf16>
    %c0_5 = arith.constant 0 : index
    %c0_6 = arith.constant 0 : index
    %19 = vector.load %arg4[%c0_5, %c0_6] : memref<128x128xbf16, #tpu.memory_space<vmem>>, vector<128x128xbf16>
    %cst_7 = arith.constant dense<0.000000e+00> : vector<16x128xf32>
    %20 = tpu.matmul %18, %19, %cst_7 {dimension_numbers = #tpu.dot_dimension_numbers<[1], [0], [0], [1], [0, 0, 1, 1], [], []>} : vector<16x128xbf16>, vector<128x128xbf16>, vector<16x128xf32> -> vector<16x128xf32>
    %c0_8 = arith.constant 0 : index
    %c0_9 = arith.constant 0 : index
    %21 = vector.load %arg5[%c0_8, %c0_9] : memref<1x128xf32, #tpu.memory_space<vmem>>, vector<1x128xf32>
    %22 = vector.broadcast %21 : vector<1x128xf32> to vector<16x128xf32>
    %23 = arith.addf %20, %22 : vector<16x128xf32>
    %cst_10 = arith.constant 0.000000e+00 : f32
    %24 = vector.broadcast %cst_10 : f32 to vector<16x128xf32>
    %25 = arith.maximumf %23, %24 : vector<16x128xf32>
    %26 = arith.truncf %25 : vector<16x128xf32> to vector<16x128xbf16>
    %c0_11 = arith.constant 0 : index
    %c0_12 = arith.constant 0 : index
    %27 = vector.load %arg6[%c0_11, %c0_12] : memref<128x128xbf16, #tpu.memory_space<vmem>>, vector<128x128xbf16>
    %cst_13 = arith.constant dense<0.000000e+00> : vector<16x128xf32>
    %28 = tpu.matmul %26, %27, %cst_13 {dimension_numbers = #tpu.dot_dimension_numbers<[1], [0], [0], [1], [0, 0, 1, 1], [], []>} : vector<16x128xbf16>, vector<128x128xbf16>, vector<16x128xf32> -> vector<16x128xf32>
    %c0_14 = arith.constant 0 : index
    %c0_15 = arith.constant 0 : index
    %29 = vector.load %arg7[%c0_14, %c0_15] : memref<1x128xf32, #tpu.memory_space<vmem>>, vector<1x128xf32>
    %30 = vector.broadcast %29 : vector<1x128xf32> to vector<16x128xf32>
    %31 = arith.addf %28, %30 : vector<16x128xf32>
    %32 = vector.extract_strided_slice %31 {offsets = [0, 0], sizes = [16, 3], strides = [1, 1]} : vector<16x128xf32> to vector<16x3xf32>
    %c0_16 = arith.constant 0 : index
    %c0_17 = arith.constant 0 : index
    %33 = vector.load %arg8[%c0_16, %c0_17] : memref<16x3xf32, #tpu.memory_space<vmem>>, vector<16x3xf32>
    tpu.vector_store %arg8[%c0_16, %c0_17], %32 {strides = array<i32>} : memref<16x3xf32, #tpu.memory_space<vmem>>, vector<16x3xf32>,
    return
  }
  func.func @transform_0(%arg0: i32) -> (i32, i32) {
    %c0_i32 = arith.constant 0 : i32
    %c0_i32_0 = arith.constant 0 : i32
    return %arg0, %c0_i32 : i32, i32
  }
  func.func @transform_1(%arg0: i32) -> (i32, i32) {
    %c0_i32 = arith.constant 0 : i32
    %c0_i32_0 = arith.constant 0 : i32
    %c0_i32_1 = arith.constant 0 : i32
    return %c0_i32, %c0_i32_0 : i32, i32
  }
  func.func @transform_2(%arg0: i32) -> (i32, i32) {
    %c0_i32 = arith.constant 0 : i32
    %c0_i32_0 = arith.constant 0 : i32
    %c0_i32_1 = arith.constant 0 : i32
    return %c0_i32, %c0_i32_0 : i32, i32
  }
  func.func @transform_3(%arg0: i32) -> (i32, i32) {
    %c0_i32 = arith.constant 0 : i32
    %c0_i32_0 = arith.constant 0 : i32
    %c0_i32_1 = arith.constant 0 : i32
    return %c0_i32, %c0_i32_0 : i32, i32
  }
  func.func @transform_4(%arg0: i32) -> (i32, i32) {
    %c0_i32 = arith.constant 0 : i32
    %c0_i32_0 = arith.constant 0 : i32
    %c0_i32_1 = arith.constant 0 : i32
    return %c0_i32, %c0_i32_0 : i32, i32
  }
  func.func @transform_5(%arg0: i32) -> (i32, i32) {
    %c0_i32 = arith.constant 0 : i32
    %c0_i32_0 = arith.constant 0 : i32
    %c0_i32_1 = arith.constant 0 : i32
    return %c0_i32, %c0_i32_0 : i32, i32
  }
  func.func @transform_6(%arg0: i32) -> (i32, i32) {
    %c0_i32 = arith.constant 0 : i32
    %c0_i32_0 = arith.constant 0 : i32
    %c0_i32_1 = arith.constant 0 : i32
    return %c0_i32, %c0_i32_0 : i32, i32
  }
  func.func @transform_7(%arg0: i32) -> (i32, i32) {
    %c0_i32 = arith.constant 0 : i32
    %c0_i32_0 = arith.constant 0 : i32
    return %arg0, %c0_i32 : i32, i32
  }
}

</mosaic_0001>

<bundles_post_ra>
// kernel: ascii_mlp_forward.1
= control target key start
LH: loop header
LB: loop body
LE: loop exit
PB: predicated region body
PF: predicated region fallthrough
CT: control target
= control target key end

     0   :  { %12 = vsyncpa [#allocation3], 0  ;;  %s492_s0 = inlined_call_operand.vmem [shape: f32[16,2], index: 0, kind: input, shape index: {}]   ;;  %s493_s1 = inlined_call_operand.vmem [shape: f32[2,128], index: 1, kind: input, shape index: {}]   ;;  %s494_s2 = inlined_call_operand.vmem [shape: f32[1,128], index: 2, kind: input, shape index: {}]   ;;  %s495_s3 = inlined_call_operand.hbm [shape: bf16[128,128], index: 3, kind: input, shape index: {}]   ;;  %s496_s4 = inlined_call_operand.vmem [shape: f32[1,128], index: 4, kind: input, shape index: {}]   ;;  %s497_s5 = inlined_call_operand.hbm [shape: bf16[128,128], index: 5, kind: input, shape index: {}]   ;;  %s498_s6 = inlined_call_operand.vmem [shape: f32[1,128], index: 6, kind: input, shape index: {}]   ;;  %s499_s7 = inlined_call_operand.vmem [shape: f32[16,3], index: 7, kind: output, shape index: {}]  }
   0x1   :  { %s24_s26 = sshll.u32 %s495_s3, 4  ;;  %s25_s26 = int_to_ptr.hbm [resolvable:$true] %s24_s26 }
   0x2   :  { %13 = vsyncpa [#allocation5], 0  ;;  %s416_s27 = smov [#allocation2]   ;;  %s39_s8 = sshll.u32 %s497_s5, 4  ;;  %s40_s8 = int_to_ptr.hbm [resolvable:$true] %s39_s8 }
   0x3   :  { %s26_s28 = sshll.u32 %s416_s27, 4  ;;  %s417_s9 = smov 64   ;;  %s27_s28 = int_to_ptr.vmem [resolvable:$true] %s26_s28 }
   0x4   :  { %s418_s10 = smov 4   ;;  %s419_s11 = smov [#allocation4]  }
   0x5   :  { %32 = dma.hbm_to_vmem [thread:$0]  %s25_s26, 1024, %s27_s28, [#allocation3], %s417_s9, %s417_s9, %s418_s10  }
   0x6   :  { %s41_s12 = sshll.u32 %s419_s11, 4  ;;  %s42_s12 = int_to_ptr.vmem [resolvable:$true] %s41_s12 }
   0x7   :  { %47 = dma.hbm_to_vmem [thread:$0]  %s40_s8, 1024, %s42_s12, [#allocation5], %s417_s9, %s417_s9, %s418_s10  }
   0x8   :  { %412 = dma.done.wait [#allocation3], 1024  }
   0x9   :  { %413 = vsyncadd [#allocation3], 4294966272 }
   0xa   :  { %414 = dma.done.wait [#allocation5], 1024  }
   0xb   :  { %415 = vsyncadd [#allocation5], 4294966272  ;;  %v420_v0 = vmov 1   ;;  %v421_v1 = vmov 0   ;;  %v58_v2 = vld [vmem:[%s492_s0] sm:$0xff]  ;;  %v343_v3 = vld [vmem:[#allocation2 + $0x38] sm:$0xff] }
   0xc   :  { %359 = vset.pattern.permute.xlu1 %v420_v0  ;;  %358 = vset.pattern.permute.xlu0 %v421_v1  ;;  %v342_v4 = vld [vmem:[#allocation2 + $0x30] sm:$0xff]  ;;  %v59_v5 = vld [vmem:[%s492_s0 + $0x8] sm:$0xff]  ;;  %v340_v7 = vld [vmem:[#allocation2 + $0x20] sm:$0xff]  ;;  %vm263_vm0 = vcmask 23552  }
   0xd   :  { %75 = vperm.xlu1 %359, %v58_v2   ;;  %63 = vperm.xlu0 %358, %v58_v2   ;;  %v341_v6 = vld [vmem:[#allocation2 + $0x28] sm:$0xff]  ;;  %v339_v8 = vld [vmem:[#allocation2 + $0x18] sm:$0xff]  ;;  %v338_v9 = vld [vmem:[#allocation2 + $0x10] sm:$0xff] }
   0xe   :  { %164 = vmatpush.bf16.msra.mxu0 %v343_v3  ;;  %v337_v10 = vld [vmem:[#allocation2 + $0x8] sm:$0xff]  ;;  %v336_v11 = vld [vmem:[#allocation2] sm:$0xff]  ;;  %v351_v12 = vld [vmem:[#allocation4 + $0x38] sm:$0xff] }
   0xf   :  { %249 = vmatpush.bf16.msra.mxu1 %v351_v12  ;;  %v350_v13 = vld [vmem:[#allocation4 + $0x30] sm:$0xff]  ;;  %v349_v14 = vld [vmem:[#allocation4 + $0x28] sm:$0xff]  ;;  %v60_v15 = vld [vmem:[%s493_s1] sm:$0x3] }
  0x10   :  { %v348_v16 = vld [vmem:[#allocation4 + $0x20] sm:$0xff]  ;;  %v82_v17 = vperm.slane %v60_v15, 1  ;;  %v71_v18 = vperm.slane %v60_v15, 0  ;;  %v347_v35 = vld [vmem:[#allocation4 + $0x18] sm:$0xff]  ;;  %v346_v36 = vld [vmem:[#allocation4 + $0x10] sm:$0xff] }
  0x11   :  { %v361_v24 = vld [vmem:[%s494_s2] ss:$0 sm:$0xff]  ;;  %v345_v37 = vld [vmem:[#allocation4 + $0x8] sm:$0xff] }
  0x12   :  { %165 = vmatpush.bf16.msra.mxu0 %v342_v4  ;;  %v344_v38 = vld [vmem:[#allocation4] sm:$0xff] }
  0x13   :  { %250 = vmatpush.bf16.msra.mxu1 %v350_v13  ;;  %v362_v40 = vld [vmem:[%s496_s4] ss:$0 sm:$0xff] }
  0x14   :  { %v363_v47 = vld [vmem:[%s498_s6] ss:$0 sm:$0xff] }
  0x15   :  { %79 = vperm.xlu1 %359, %v59_v5   ;;  %68 = vperm.xlu0 %358, %v59_v5  }
  0x16   :  { %166 = vmatpush.bf16.msra.mxu0 %v341_v6 }
  0x17   :  { %251 = vmatpush.bf16.msra.mxu1 %v349_v14 }
  0x1a   :  { %167 = vmatpush.bf16.msra.mxu0 %v340_v7 }
  0x1b   :  { %252 = vmatpush.bf16.msra.mxu1 %v348_v16 }
  0x1d   :  { %360 = vset.pattern.permute.xlu0 %v420_v0 }
  0x1e   :  { %168 = vmatpush.bf16.msra.mxu0 %v339_v8 }
  0x1f   :  { %253 = vmatpush.bf16.msra.mxu1 %v347_v35 }
  0x22   :  { %169 = vmatpush.bf16.msra.mxu0 %v338_v9 }
  0x23   :  { %254 = vmatpush.bf16.msra.mxu1 %v346_v36 }
  0x26   :  { %170 = vmatpush.bf16.msra.mxu0 %v337_v10 }
  0x27   :  { %255 = vmatpush.bf16.msra.mxu1 %v345_v37 }
  0x2a   :  { %171 = vmatpush.bf16.msra.mxu0 %v336_v11 }
  0x2b   :  { %256 = vmatpush.bf16.msra.mxu1 %v344_v38 }
  0x7f   :  { %v76_v19 = vpop.permute.xlu1 %75  ;;  %v64_v20 = vpop.permute.xlu0 %63 }
  0x80   :  { %v83_v21 = vmul.f32 %v82_v17, %v76_v19  ;;  %v72_v22 = vmul.f32 %v71_v18, %v64_v20 }
  0x82   :  { %v85_v23 = vadd.f32 %v83_v21, %v72_v22 }
  0x84   :  { %v91_v30 = vadd.f32 %v361_v24, %v85_v23 }
  0x86   :  { %v93_v32 = vmax.f32 %v91_v30, 0.0 }
  0x87   :  { %v80_v25 = vpop.permute.xlu1 %79  ;;  %v69_v26 = vpop.permute.xlu0 %68 }
  0x88   :  { %v84_v27 = vmul.f32 %v82_v17, %v80_v25  ;;  %v73_v28 = vmul.f32 %v71_v18, %v69_v26 }
  0x8a   :  { %v86_v29 = vadd.f32 %v84_v27, %v73_v28 }
  0x8c   :  { %v92_v31 = vadd.f32 %v361_v24, %v86_v29 }
  0x8e   :  { %v94_v33 = vmax.f32 %v92_v31, 0.0 }
  0x90   :  { %v95_v34 = vpack.c.bf16 %v94_v33, %v93_v32 }
  0x92   :  { %172 = vmatmul.bf16.vlgmr.msra.gmra.mxu0 %v95_v34 }
 0x10f   :  { %v173_v39 = vpop.f32.mrf.mxu0 }
 0x110   :  { %v174_v41 = vadd.f32 %v362_v40, %v173_v39 }
 0x112   :  { %v178_v44 = vmax.f32 %v174_v41, 0.0 }
 0x117   :  { %v175_v42 = vpop.f32.mrf.mxu0 }
 0x118   :  { %v176_v43 = vadd.f32 %v362_v40, %v175_v42 }
 0x11a   :  { %v179_v45 = vmax.f32 %v176_v43, 0.0 }
 0x11c   :  { %v180_v46 = vpack.c.bf16 %v179_v45, %v178_v44 }
 0x11e   :  { %257 = vmatmul.bf16.vlgmr.msra.gmra.mxu1 %v180_v46 }
 0x19b   :  { %v258_v48 = vpop.f32.mrf.mxu1 }
 0x19c   :  { %v259_v49 = vadd.f32 %v363_v47, %v258_v48 }
 0x19e   :  { %264 = vst.msk [vmem:[%s499_s7] sm:$0xff] %vm263_vm0, %v259_v49 }
 0x1a3   :  { %v260_v50 = vpop.f32.mrf.mxu1 }
 0x1a4   :  { %v261_v51 = vadd.f32 %v363_v47, %v260_v50 }
 0x1a6   :  { %265 = vst.msk [vmem:[%s499_s7 + $0x8] sm:$0xff] %vm263_vm0, %v261_v51 }
 0x1a7   :  { %270 = vsyncpa [#allocation3], 1 }
 0x1a8   :  { %271 = vsyncpa [#allocation5], 1 }

</bundles_post_ra>
